<compile_context>
chip_gen: v7x
topology: tpu7x:2x2x1
jax: 0.10.0
libtpu: 0.0.40
codegen_flags: <defaults>
</compile_context>

<pallas_src>
from typing import NamedTuple, Optional

import jax
import jax.numpy as jnp
from jax.experimental import pallas as pl
from jax.experimental.pallas import tpu as pltpu


def _cdiv(a, b):
    return (a + b - 1) // b


def _round_up(x, m):
    return ((x + m - 1) // m) * m


def _choose_tile(total, target, align):
    """Tile size (multiple of `align`) close to `target` minimizing padding."""
    if total <= target:
        return _round_up(total, align)
    n_tiles = _cdiv(total, target)
    return _round_up(_cdiv(total, n_tiles), align)


def _vmem_budget_bytes():
    """Generation-aware (tile budget, scoped-vmem-limit cap)."""
    cap = 64 * 1024 * 1024  # conservative default: v7x has 64 MiB per TC
    try:
        info = pltpu.get_tpu_info()
        c = getattr(info, "vmem_capacity_bytes", None)
        if c:
            cap = int(c)
    except Exception:
        pass
    if cap >= 96 * 1024 * 1024:                    # v5e / v6e: 128 MiB physical
        return 96 * 1024 * 1024, 100 * 1024 * 1024
    return 44 * 1024 * 1024, 56 * 1024 * 1024      # v7x: leave compiler headroom


def _mlp2_kernel(x_ref, w_ref, b_ref, o1_ref, o2_ref, acc1_ref, acc2_ref):
    """One grid step: x(tm,tk) @ stacked W(2,tk,tn) -> two (tm,tn) outputs.

    Grid = (N-tiles, B-tiles, K-tiles); K (reduction over D_in) is innermost
    and accumulated into f32 VMEM scratch; bias add + cast on the last K step.
    """
    @pl.when(pl.program_id(2) == 0)
    def _():
        acc1_ref[...] = jnp.zeros_like(acc1_ref)
        acc2_ref[...] = jnp.zeros_like(acc2_ref)

    x = x_ref[...]
    acc1_ref[...] += jnp.dot(x, w_ref[0], preferred_element_type=jnp.float32)
    acc2_ref[...] += jnp.dot(x, w_ref[1], preferred_element_type=jnp.float32)

    @pl.when(pl.program_id(2) == pl.num_programs(2) - 1)
    def _():
        b32 = b_ref[...].astype(jnp.float32)          # (2, 1, tn)
        o1_ref[...] = (acc1_ref[...] + b32[0]).astype(o1_ref.dtype)
        o2_ref[...] = (acc2_ref[...] + b32[1]).astype(o2_ref.dtype)


class MLPParams(NamedTuple):
    w: jax.Array                 # (2, Kp, Hp)  stacked, padded [W1; W2]
    b: jax.Array                 # (2, 1, Hp)   stacked f32 [b1; b2]
    din: int
    hidden: int
    kp: int
    hp: int
    tn: int
    tk: int
    compute_dtype: Optional[jnp.dtype]
    vmem_budget: int
    vmem_limit_cap: int


def prepare_mlp_params(w1, b1, w2, b2, *, compute_dtype=None, tn=None,
                       tn_target=512):
    """Fuse / pad the two Linear layers' parameters ONCE at setup time.

    w1, w2: (D_in, H)  (transposed from PyTorch's (H, D_in) weight layout)
    b1, b2: (H,)
    """
    din, hidden = w1.shape
    budget, limit_cap = _vmem_budget_bytes()

    w_dtype = compute_dtype if compute_dtype is not None else w1.dtype
    in_bytes = jnp.dtype(w_dtype).itemsize

    # --- output-column tile: lane-aligned, minimal padding of H ---
    if tn is None:
        tn = _choose_tile(hidden, tn_target, 128)
        # keep the resident weight tiles from hogging VMEM (floor 256)
        while 2 * (2 * din * tn * in_bytes) > budget // 3 and tn > 256:
            tn = max(256, _round_up(tn // 2, 128))
    hp = _round_up(hidden, tn)

    # --- reduction (D_in) tile: a single K tile unless D_in is huge ---
    tm_nominal = 256
    if 2 * (2 * din * tn + tm_nominal * din) * in_bytes <= budget // 2:
        tk, kp = din, din
    else:
        tk = 512
        while (2 * (2 * tk * tn + tm_nominal * tk) * in_bytes > budget // 2
               and tk > 128):
            tk //= 2
        kp = _round_up(din, tk)

    w = jnp.stack([w1, w2], axis=0)                      # (2, D_in, H)
    b = jnp.stack([b1, b2], axis=0).astype(jnp.float32)[:, None, :]  # (2,1,H)
    if hp != hidden or kp != din:
        w = jnp.pad(w, ((0, 0), (0, kp - din), (0, hp - hidden)))
        b = jnp.pad(b, ((0, 0), (0, 0), (0, hp - hidden)))
    if compute_dtype is not None:
        w = w.astype(compute_dtype)

    return MLPParams(w=w, b=b, din=din, hidden=hidden, kp=kp, hp=hp,
                     tn=tn, tk=tk, compute_dtype=compute_dtype,
                     vmem_budget=budget, vmem_limit_cap=limit_cap)


def mlp_model_forward(x, params: MLPParams, *, tm=None):
    """Pallas equivalent of MLPModel.forward: returns [mlp1(x), mlp2(x)]."""
    B, din = x.shape
    assert din == params.din, "input_dim mismatch with prepared params"
    out_dtype = x.dtype

    if params.compute_dtype is not None and x.dtype != params.compute_dtype:
        x = x.astype(params.compute_dtype)

    in_bytes = jnp.dtype(x.dtype).itemsize
    out_bytes = jnp.dtype(out_dtype).itemsize
    row_align = 16 if in_bytes < 4 else 8   # packed sublanes for bf16

    tn, tk, kp, hp = params.tn, params.tk, params.kp, params.hp
    budget = params.vmem_budget

    # --- batch tile: x-resident single tile when x is small (always true for
    #     this MLP's tiny D_in); otherwise ~256 rows with minimal padding
    #     (B=300 -> tm=152, Bp=304). ---
    if tm is None:
        if B * kp * in_bytes <= 4 * 1024 * 1024 and B <= 1024:
            tm = _round_up(B, row_align)
        else:
            tm = _choose_tile(B, 256, row_align)

    def vmem_estimate(tm_):
        x_buf = tm_ * tk * in_bytes
        w_buf = 2 * tk * tn * in_bytes
        b_buf = 2 * tn * 4
        o_buf = 2 * tm_ * tn * out_bytes
        acc = 2 * tm_ * tn * 4
        return 2 * (x_buf + w_buf + b_buf + o_buf) + acc   # double-buffered

    # VMEM-bound: shrink tm first (extra grid steps are cheap); tn/tk were
    # already sized against the budget in prepare_mlp_params.
    while vmem_estimate(tm) > budget and tm > 64:
        tm = max(64, _round_up(tm // 2, row_align))

    bp = _round_up(B, tm)
    if bp != B or kp != din:
        x = jnp.pad(x, ((0, bp - B), (0, kp - din)))

    nj, ni, nk = hp // tn, bp // tm, kp // tk
    # N tiles outermost (megacore shards the resident weights per TC),
    # batch in the middle, reduction innermost.
    grid = (nj, ni, nk)

    est = vmem_estimate(tm)
    vmem_limit = min(params.vmem_limit_cap,
                     max(int(est * 5 // 4), 32 * 1024 * 1024))

    cost = pl.CostEstimate(
        flops=4 * bp * kp * hp,          # two heads: 2 * (2*B*K*H)
        transcendentals=0,
        bytes_accessed=(nj * bp * kp * in_bytes                         # x re-reads
                        + (ni if nk > 1 else 1) * 2 * kp * hp * in_bytes  # weights
                        + 2 * hp * 4                                      # bias
                        + 2 * bp * hp * out_bytes),                       # outputs
    )

    out1, out2 = pl.pallas_call(
        _mlp2_kernel,
        out_shape=(jax.ShapeDtypeStruct((bp, hp), out_dtype),
                   jax.ShapeDtypeStruct((bp, hp), out_dtype)),
        grid_spec=pltpu.PrefetchScalarGridSpec(
            num_scalar_prefetch=0,
            grid=grid,
            in_specs=[
                pl.BlockSpec((tm, tk), lambda j, i, k: (i, k)),        # x
                pl.BlockSpec((2, tk, tn), lambda j, i, k: (0, k, j)),  # [W1;W2]
                pl.BlockSpec((2, 1, tn), lambda j, i, k: (0, 0, j)),   # [b1;b2]
            ],
            out_specs=[
                pl.BlockSpec((tm, tn), lambda j, i, k: (i, j)),        # emb1
                pl.BlockSpec((tm, tn), lambda j, i, k: (i, j)),        # emb2
            ],
            scratch_shapes=[pltpu.VMEM((tm, tn), jnp.float32),
                            pltpu.VMEM((tm, tn), jnp.float32)],
        ),
        compiler_params=pltpu.CompilerParams(
            dimension_semantics=("parallel", "parallel", "arbitrary"),
            vmem_limit_bytes=vmem_limit,
        ),
        cost_estimate=cost,
    )(x, params.w, params.b)

    # Only slice when padding was actually needed (B % 8 != 0 or H % tn != 0).
    if bp != B or hp != params.hidden:
        out1 = out1[:B, :params.hidden]
        out2 = out2[:B, :params.hidden]
    return [out1, out2]


def mlp_model_forward_from_weights(x, w1, b1, w2, b2, *, compute_dtype=None):
    """Convenience wrapper. For repeated forwards, call prepare_mlp_params()
    once and reuse the result (hoists the weight stack/pad off the step)."""
    params = prepare_mlp_params(w1, b1, w2, b2, compute_dtype=compute_dtype)
    return mlp_model_forward(x, params)


if __name__ == "__main__":
    # Small shapes consistent with MLPModel(input_dim, hidden_dim).
    batch, input_dim, hidden_dim = 8, 4, 128

    key = jax.random.PRNGKey(0)
    kx, kw1, kb1, kw2, kb2 = jax.random.split(key, 5)

    bound = 1.0 / (input_dim ** 0.5)
    x = jax.random.normal(kx, (batch, input_dim), dtype=jnp.float32)
    w1 = jax.random.uniform(kw1, (input_dim, hidden_dim), jnp.float32, -bound, bound)
    b1 = jax.random.uniform(kb1, (hidden_dim,), jnp.float32, -bound, bound)
    w2 = jax.random.uniform(kw2, (input_dim, hidden_dim), jnp.float32, -bound, bound)
    b2 = jax.random.uniform(kb2, (hidden_dim,), jnp.float32, -bound, bound)

    # 1) tiny case: single (1,1,1)-grid block, x fully VMEM-resident.
    params = prepare_mlp_params(w1, b1, w2, b2)   # fused/padded once (setup time)
    emb1, emb2 = mlp_model_forward(x, params)
    jax.block_until_ready(emb1)
    jax.block_until_ready(emb2)

    ref1 = x @ w1 + b1
    ref2 = x @ w2 + b2
    assert emb1.shape == (batch, hidden_dim) and emb2.shape == (batch, hidden_dim)
    assert jnp.allclose(emb1, ref1, atol=1e-5), "mlp1 mismatch"
    assert jnp.allclose(emb2, ref2, atol=1e-5), "mlp2 mismatch"

    # 2) ragged / multi-tile case: minimal batch padding (300 -> 304), two N
    #    tiles of 384, two direct outputs (no fused-slab post-slicing).
    B2, H2 = 300, 768
    kx2, kw3, kb3, kw4, kb4 = jax.random.split(jax.random.PRNGKey(1), 5)
    x2 = jax.random.normal(kx2, (B2, input_dim), dtype=jnp.float32)
    w3 = jax.random.uniform(kw3, (input_dim, H2), jnp.float32, -bound, bound)
    b3 = jax.random.uniform(kb3, (H2,), jnp.float32, -bound, bound)
    w4 = jax.random.uniform(kw4, (input_dim, H2), jnp.float32, -bound, bound)
    b4 = jax.random.uniform(kb4, (H2,), jnp.float32, -bound, bound)

    params2 = prepare_mlp_params(w3, b3, w4, b4)
    e1, e2 = mlp_model_forward(x2, params2)
    jax.block_until_ready(e1)
    jax.block_until_ready(e2)
    assert e1.shape == (B2, H2) and e2.shape == (B2, H2)
    assert jnp.allclose(e1, x2 @ w3 + b3, atol=1e-4), "mlp1 (large) mismatch"
    assert jnp.allclose(e2, x2 @ w4 + b4, atol=1e-4), "mlp2 (large) mismatch"

    # TODO(synk): DDP wrapping / save_models are host/distributed concerns with
    # no kernel equivalent; only the forward math is implemented here.
    print("KERNEL_OK")
</pallas_src>

<mosaic_0001>
module attributes {stable_mosaic.version = 11 : i64} {
  func.func @_mlp2_kernel(%arg0: i32, %arg1: i32, %arg2: i32, %arg3: memref<8x4xf32, #tpu.memory_space<vmem>>, %arg4: memref<2x4x128xf32, #tpu.memory_space<vmem>>, %arg5: memref<2x1x128xf32, #tpu.memory_space<vmem>>, %arg6: memref<8x128xf32, #tpu.memory_space<vmem>>, %arg7: memref<8x128xf32, #tpu.memory_space<vmem>>, %arg8: memref<8x128xf32, #tpu.memory_space<vmem>>, %arg9: memref<8x128xf32, #tpu.memory_space<vmem>>) attributes {dimension_semantics = [#tpu.dimension_semantics<parallel>, #tpu.dimension_semantics<parallel>, #tpu.dimension_semantics<arbitrary>], iteration_bounds = array<i64: 1, 1, 1>, scalar_prefetch = 0 : i64, scratch_operands = 2 : i64, tpu.core_type = #tpu.core_type<tc>, window_params = [{transform_indices = @transform_0, window_bounds = array<i64: 8, 4>}, {transform_indices = @transform_1, window_bounds = array<i64: 2, 4, 128>}, {transform_indices = @transform_2, window_bounds = array<i64: 2, 1, 128>}, {transform_indices = @transform_3, window_bounds = array<i64: 8, 128>}, {transform_indices = @transform_4, window_bounds = array<i64: 8, 128>}]} {
    %c0_i32 = arith.constant 0 : i32
    %0 = arith.cmpi eq, %arg2, %c0_i32 : i32
    %1 = arith.extui %0 : i1 to i32
    %c0_i32_0 = arith.constant 0 : i32
    %2 = arith.cmpi ne, %1, %c0_i32_0 : i32
    scf.if %2 {
      %cst_18 = arith.constant 0.000000e+00 : f32
      %19 = vector.broadcast %cst_18 : f32 to vector<8x128xf32>
      %c0_19 = arith.constant 0 : index
      %c0_20 = arith.constant 0 : index
      %20 = vector.load %arg8[%c0_19, %c0_20] : memref<8x128xf32, #tpu.memory_space<vmem>>, vector<8x128xf32>
      tpu.vector_store %arg8[%c0_19, %c0_20], %19 {strides = array<i32>} : memref<8x128xf32, #tpu.memory_space<vmem>>, vector<8x128xf32>,
      %cst_21 = arith.constant 0.000000e+00 : f32
      %21 = vector.broadcast %cst_21 : f32 to vector<8x128xf32>
      %c0_22 = arith.constant 0 : index
      %c0_23 = arith.constant 0 : index
      %22 = vector.load %arg9[%c0_22, %c0_23] : memref<8x128xf32, #tpu.memory_space<vmem>>, vector<8x128xf32>
      tpu.vector_store %arg9[%c0_22, %c0_23], %21 {strides = array<i32>} : memref<8x128xf32, #tpu.memory_space<vmem>>, vector<8x128xf32>,
    } else {
    }
    %c0 = arith.constant 0 : index
    %c0_1 = arith.constant 0 : index
    %3 = vector.load %arg3[%c0, %c0_1] : memref<8x4xf32, #tpu.memory_space<vmem>>, vector<8x4xf32>
    %c0_2 = arith.constant 0 : index
    %c0_3 = arith.constant 0 : index
    %4 = vector.load %arg8[%c0_2, %c0_3] : memref<8x128xf32, #tpu.memory_space<vmem>>, vector<8x128xf32>
    %c0_4 = arith.constant 0 : index
    %c0_5 = arith.constant 0 : index
    %c0_6 = arith.constant 0 : index
    %5 = vector.load %arg4[%c0_4, %c0_5, %c0_6] : memref<2x4x128xf32, #tpu.memory_space<vmem>>, vector<1x4x128xf32>
    %6 = vector.shape_cast %5 : vector<1x4x128xf32> to vector<4x128xf32>
    %cst = arith.constant dense<0.000000e+00> : vector<8x128xf32>
    %7 = tpu.matmul %3, %6, %cst {dimension_numbers = #tpu.dot_dimension_numbers<[1], [0], [0], [1], [0, 0, 1, 1], [], []>} : vector<8x4xf32>, vector<4x128xf32>, vector<8x128xf32> -> vector<8x128xf32>
    %8 = arith.addf %4, %7 : vector<8x128xf32>
    %c0_7 = arith.constant 0 : index
    %c0_8 = arith.constant 0 : index
    %9 = vector.load %arg8[%c0_7, %c0_8] : memref<8x128xf32, #tpu.memory_space<vmem>>, vector<8x128xf32>
    tpu.vector_store %arg8[%c0_7, %c0_8], %8 {strides = array<i32>} : memref<8x128xf32, #tpu.memory_space<vmem>>, vector<8x128xf32>,
    %c0_9 = arith.constant 0 : index
    %c0_10 = arith.constant 0 : index
    %10 = vector.load %arg9[%c0_9, %c0_10] : memref<8x128xf32, #tpu.memory_space<vmem>>, vector<8x128xf32>
    %c1 = arith.constant 1 : index
    %c0_11 = arith.constant 0 : index
    %c0_12 = arith.constant 0 : index
    %11 = vector.load %arg4[%c1, %c0_11, %c0_12] : memref<2x4x128xf32, #tpu.memory_space<vmem>>, vector<1x4x128xf32>
    %12 = vector.shape_cast %11 : vector<1x4x128xf32> to vector<4x128xf32>
    %cst_13 = arith.constant dense<0.000000e+00> : vector<8x128xf32>
    %13 = tpu.matmul %3, %12, %cst_13 {dimension_numbers = #tpu.dot_dimension_numbers<[1], [0], [0], [1], [0, 0, 1, 1], [], []>} : vector<8x4xf32>, vector<4x128xf32>, vector<8x128xf32> -> vector<8x128xf32>
    %14 = arith.addf %10, %13 : vector<8x128xf32>
    %c0_14 = arith.constant 0 : index
    %c0_15 = arith.constant 0 : index
    %15 = vector.load %arg9[%c0_14, %c0_15] : memref<8x128xf32, #tpu.memory_space<vmem>>, vector<8x128xf32>
    tpu.vector_store %arg9[%c0_14, %c0_15], %14 {strides = array<i32>} : memref<8x128xf32, #tpu.memory_space<vmem>>, vector<8x128xf32>,
    %c0_i32_16 = arith.constant 0 : i32
    %16 = arith.cmpi eq, %arg2, %c0_i32_16 : i32
    %17 = arith.extui %16 : i1 to i32
    %c0_i32_17 = arith.constant 0 : i32
    %18 = arith.cmpi ne, %17, %c0_i32_17 : i32
    scf.if %18 {
      %c0_18 = arith.constant 0 : index
      %c0_19 = arith.constant 0 : index
      %c0_20 = arith.constant 0 : index
      %19 = vector.load %arg5[%c0_18, %c0_19, %c0_20] : memref<2x1x128xf32, #tpu.memory_space<vmem>>, vector<2x1x128xf32>
      %c0_21 = arith.constant 0 : index
      %c0_22 = arith.constant 0 : index
      %20 = vector.load %arg8[%c0_21, %c0_22] : memref<8x128xf32, #tpu.memory_space<vmem>>, vector<8x128xf32>
      %21 = vector.extract_strided_slice %19 {offsets = [0, 0, 0], sizes = [1, 1, 128], strides = [1, 1, 1]} : vector<2x1x128xf32> to vector<1x1x128xf32>
      %22 = vector.shape_cast %21 : vector<1x1x128xf32> to vector<1x128xf32>
      %23 = vector.broadcast %22 : vector<1x128xf32> to vector<8x128xf32>
      %24 = arith.addf %20, %23 : vector<8x128xf32>
      %c0_23 = arith.constant 0 : index
      %c0_24 = arith.constant 0 : index
      %25 = vector.load %arg6[%c0_23, %c0_24] : memref<8x128xf32, #tpu.memory_space<vmem>>, vector<8x128xf32>
      tpu.vector_store %arg6[%c0_23, %c0_24], %24 {strides = array<i32>} : memref<8x128xf32, #tpu.memory_space<vmem>>, vector<8x128xf32>,
      %c0_25 = arith.constant 0 : index
      %c0_26 = arith.constant 0 : index
      %26 = vector.load %arg9[%c0_25, %c0_26] : memref<8x128xf32, #tpu.memory_space<vmem>>, vector<8x128xf32>
      %27 = vector.extract_strided_slice %19 {offsets = [1, 0, 0], sizes = [1, 1, 128], strides = [1, 1, 1]} : vector<2x1x128xf32> to vector<1x1x128xf32>
      %28 = vector.shape_cast %27 : vector<1x1x128xf32> to vector<1x128xf32>
      %29 = vector.broadcast %28 : vector<1x128xf32> to vector<8x128xf32>
      %30 = arith.addf %26, %29 : vector<8x128xf32>
      %c0_27 = arith.constant 0 : index
      %c0_28 = arith.constant 0 : index
      %31 = vector.load %arg7[%c0_27, %c0_28] : memref<8x128xf32, #tpu.memory_space<vmem>>, vector<8x128xf32>
      tpu.vector_store %arg7[%c0_27, %c0_28], %30 {strides = array<i32>} : memref<8x128xf32, #tpu.memory_space<vmem>>, vector<8x128xf32>,
    } else {
    }
    return
  }
  func.func @transform_0(%arg0: i32, %arg1: i32, %arg2: i32) -> (i32, i32) {
    %c0_i32 = arith.constant 0 : i32
    return %arg1, %arg2 : i32, i32
  }
  func.func @transform_1(%arg0: i32, %arg1: i32, %arg2: i32) -> (i32, i32, i32) {
    %c0_i32 = arith.constant 0 : i32
    %c0_i32_0 = arith.constant 0 : i32
    return %c0_i32, %arg2, %arg0 : i32, i32, i32
  }
  func.func @transform_2(%arg0: i32, %arg1: i32, %arg2: i32) -> (i32, i32, i32) {
    %c0_i32 = arith.constant 0 : i32
    %c0_i32_0 = arith.constant 0 : i32
    %c0_i32_1 = arith.constant 0 : i32
    return %c0_i32, %c0_i32_0, %arg0 : i32, i32, i32
  }
  func.func @transform_3(%arg0: i32, %arg1: i32, %arg2: i32) -> (i32, i32) {
    %c0_i32 = arith.constant 0 : i32
    return %arg1, %arg0 : i32, i32
  }
  func.func @transform_4(%arg0: i32, %arg1: i32, %arg2: i32) -> (i32, i32) {
    %c0_i32 = arith.constant 0 : i32
    return %arg1, %arg0 : i32, i32
  }
}

</mosaic_0001>

<bundles_post_ra>
// kernel: tpu_custom_call.1
= control target key start
LH: loop header
LB: loop body
LE: loop exit
PB: predicated region body
PF: predicated region fallthrough
CT: control target
= control target key end

     0   :  { %10 = vsyncpa [#allocation5], 0  ;;  %vm31_vm0 = vcmask 1043456   ;;  %v309_v1 = vmov 0.0   ;;  %vm27_vm1 = vcmask 31744   ;;  %s377_s0 = inlined_call_operand.vmem [shape: f32[8,4], index: 0, kind: input, shape index: {}]   ;;  %s378_s1 = inlined_call_operand.vmem [shape: f32[2,4,128], index: 1, kind: input, shape index: {}]   ;;  %s379_s2 = inlined_call_operand.vmem [shape: f32[2,1,128], index: 2, kind: input, shape index: {}]   ;;  %s380_s3 = inlined_call_operand.hbm [shape: f32[8,128], index: 3, kind: output, shape index: {0}]   ;;  %s381_s4 = inlined_call_operand.hbm [shape: f32[8,128], index: 4, kind: output, shape index: {1}]  }
   0x1   :  { %v26_v0 = vld [vmem:[%s378_s1] sm:$0xf]  ;;  %247 = vmatprep.subr.mxu0 %v309_v1  ;;  %252 = vmatprep.subr.mxu1 %v309_v1  ;;  %v238_v2 = vld [vmem:[%s378_s1 + $0x4] sm:$0xf] }
   0x2   :  { %v24_v3 = vld [vmem:[%s377_s0] sm:$0xff] }
   0x3   :  { %11 = vsyncpa [#allocation7], 0  ;;  %248 = vmatpush3.msk.msra.mxu0 %vm31_vm0, %v26_v0  ;;  %vm310_vm2 = vmmov 0   ;;  %253 = vmatpush3.msk.msra.mxu1 %vm31_vm0, %v238_v2  ;;  %v241_v4 = vld [vmem:[%s379_s2] ss:$0 sm:$0xff]  ;;  %s311_s1 = smov [#allocation4]  }
   0x4   :  { %249 = vmatprep.mubr.msk.f32.mxu0 %vm310_vm2, %v309_v1  ;;  %254 = vmatprep.mubr.msk.f32.mxu1 %vm310_vm2, %v309_v1  ;;  %v242_v5 = vld [vmem:[%s379_s2 + $0x1] ss:$0 sm:$0xff]  ;;  %s214_s25 = sshll.u32 %s311_s1, 4  ;;  %s312_s0 = smov [#allocation6]   ;;  %s215_s25 = int_to_ptr.vmem [resolvable:$true] %s214_s25 }
   0x5   :  { %250 = vmatmul.mubr.msk.f32.vlgmr.msra.gmra.mrb[0].mxu0 %vm27_vm1, %v24_v3  ;;  %255 = vmatmul.mubr.msk.f32.vlgmr.msra.gmra.mrb[0].mxu1 %vm27_vm1, %v24_v3  ;;  %s224_s26 = sshll.u32 %s312_s0, 4  ;;  %s261_s27 = scalar_lea.vmem %s215_s25, 128  ;;  %s225_s26 = int_to_ptr.vmem [resolvable:$true] %s224_s26 }
   0x6   :  { %p262_p0 = scmp.ne.s32.totalorder %s215_s25, %s261_s27  ;;  %p266_p1 = scmp.lt.s32.totalorder %s215_s25, %s215_s25 }
   0x7   :  { %p267_p2 = scmp.lt.s32.totalorder %s261_s27, %s261_s27 }
   0x9   :  { %p268_p3 = por %p267_p2, %p266_p1 }
   0xb   :  { %p269_p4 = pnand %p268_p3, %p262_p0 }
  0xd8   :  { %v101_v6 = vpop.f32.mrb[0].mxu0  ;;  %v179_v7 = vpop.f32.mrb[0].mxu1 }
  0xd9   :  { %v197_v8 = vadd.f32 %v241_v4, %v101_v6  ;;  %v206_v9 = vadd.f32 %v242_v5, %v179_v7  ;;  %v251_v10 = vpop.f32.mrb[1].mxu0  ;;  %v256_v11 = vpop.f32.mrb[1].mxu1 }
  0xdb   :  { %198 = vst [vmem:[#allocation4] sm:$0xff] %v197_v8  ;;  %207 = vst [vmem:[#allocation6] sm:$0xff] %v206_v9 }
  0xdc   :  { %272 = shalt.err (!%p269_p4)
}
  0xdd   :  { %s273_s29 = scalar_lea.hbm %s380_s3, 128 }
  0xde   :  { %p274_p5 = scmp.ne.s32.totalorder %s380_s3, %s273_s29  ;;  %p277_p6 = scmp.lt.u32.totalorder %s273_s29, %s380_s3 }
  0xe0   :  { %p279_p7 = pnand %p277_p6, %p274_p5 }
  0xe2   :  { %282 = shalt.err (!%p279_p7)
}
  0xe3   :  { %217 = dma.vmem_to_hbm [thread:$0]  %s215_s25, 128, %s380_s3, [#allocation5]  }
  0xe4   :  { %s283_s10 = scalar_lea.vmem %s225_s26, 128  ;;  %p288_p9 = scmp.lt.s32.totalorder %s225_s26, %s225_s26 }
  0xe5   :  { %p284_p8 = scmp.ne.s32.totalorder %s225_s26, %s283_s10  ;;  %p289_p10 = scmp.lt.s32.totalorder %s283_s10, %s283_s10 }
  0xe7   :  { %p290_p11 = por %p289_p10, %p288_p9 }
  0xe9   :  { %p291_p12 = pnand %p290_p11, %p284_p8 }
  0xeb   :  { %294 = shalt.err (!%p291_p12)
}
  0xec   :  { %s295_s13 = scalar_lea.hbm %s381_s4, 128 }
  0xed   :  { %p296_p13 = scmp.ne.s32.totalorder %s381_s4, %s295_s13  ;;  %p299_p0 = scmp.lt.u32.totalorder %s295_s13, %s381_s4 }
  0xef   :  { %p301_p1 = pnand %p299_p0, %p296_p13 }
  0xf1   :  { %304 = shalt.err (!%p301_p1)
}
  0xf2   :  { %227 = dma.vmem_to_hbm [thread:$0]  %s225_s26, 128, %s381_s4, [#allocation7]  }
  0xf3   :  { %305 = dma.done.wait [#allocation5], 128  }
  0xf4   :  { %306 = vsyncadd [#allocation5], 4294967168 }
  0xf5   :  { %307 = dma.done.wait [#allocation7], 128  }
  0xf6   :  { %308 = vsyncadd [#allocation7], 4294967168 }
  0xf7   :  { %234 = vsyncpa [#allocation5], 1 }
  0xf8   :  { %235 = vsyncpa [#allocation7], 1 }

</bundles_post_ra>
